<compile_context>
chip_gen: v7x
topology: tpu7x:2x2x1
jax: 0.10.0
libtpu: 0.0.40
codegen_flags: <defaults>
</compile_context>

<pallas_src>
import functools

import jax
import jax.numpy as jnp
from jax.experimental import pallas as pl
from jax.experimental.pallas import tpu as pltpu

INPUT_SIZE = 5
HIDDEN_SIZE = 128
OUTPUT_SIZE = 5

_SINGLE_SHOT_MAX_ROWS = 1024   # below this, one gridless launch beats tiling
_MAX_BLOCK_M = 2048            # 1024-2048 amortizes the ~0.35 us/grid-step cost
_BLOCK_M_ALIGN = 256           # MXU-friendly row multiple (v6e/v7x 256x256 MXU)


def _round_up(n, m):
    return ((n + m - 1) // m) * m


def _mlp_kernel(x_ref, w1_ref, b1_ref, w2_ref, b2_ref, w3_ref, b3_ref, o_ref,
                *, compute_dtype):
    # Layer 1: (TM, 5) @ (5, 128) + (1, 128) -> ReLU.  Mosaic pads the K=5
    # contraction to the MXU tile internally; no host/kernel zero-padding.
    x = x_ref[...].astype(compute_dtype)
    h1 = jnp.dot(x, w1_ref[...], preferred_element_type=jnp.float32)
    h1 = jnp.maximum(h1 + b1_ref[...], 0.0).astype(compute_dtype)
    # Layer 2: (TM, 128) @ (128, 128) + (1, 128) -> ReLU
    h2 = jnp.dot(h1, w2_ref[...], preferred_element_type=jnp.float32)
    h2 = jnp.maximum(h2 + b2_ref[...], 0.0).astype(compute_dtype)
    # Layer 3: (TM, 128) @ (128, 5) + (1, 5)  (few masked stores; not a binder)
    out = jnp.dot(h2, w3_ref[...], preferred_element_type=jnp.float32)
    o_ref[...] = (out + b3_ref[...]).astype(o_ref.dtype)


def _pick_block_m(batch):
    # Keep >= 2 tiles so v7x's two TensorCores both get work under
    # dimension_semantics=("parallel",); tiles are multiples of 256 rows and
    # capped at 2048 (per-step overhead amortized, VMEM ~ a few MiB everywhere).
    bm = _round_up(pl.cdiv(batch, 2), _BLOCK_M_ALIGN)
    return max(_BLOCK_M_ALIGN, min(_MAX_BLOCK_M, bm))


@functools.partial(jax.jit, static_argnames=("use_bf16",))
def enhanced_policy_forward(x, params, *, use_bf16=False):
    """x: (B, INPUT_SIZE) float32.  params: dict of w1,b1,w2,b2,w3,b3 stored
    transposed from nn.Linear, i.e. w: (in, out), b: (1, out)."""
    B = x.shape[0]
    compute_dtype = jnp.bfloat16 if use_bf16 else jnp.float32
    w1 = params["w1"].astype(compute_dtype)
    w2 = params["w2"].astype(compute_dtype)
    w3 = params["w3"].astype(compute_dtype)
    b1, b2, b3 = params["b1"], params["b2"], params["b3"]
    kernel = functools.partial(_mlp_kernel, compute_dtype=compute_dtype)

    if B <= _SINGLE_SHOT_MAX_ROWS:
        # Gridless path: every operand is a whole-array VMEM block (~70 KiB of
        # weights + a tiny activation slab).  No pipeline, no pad, no slice.
        vmem = pl.BlockSpec(memory_space=pltpu.MemorySpace.VMEM)
        return pl.pallas_call(
            kernel,
            out_shape=jax.ShapeDtypeStruct((B, OUTPUT_SIZE), jnp.float32),
            in_specs=[vmem] * 7,
            out_specs=vmem,
        )(x, w1, b1, w2, b2, w3, b3)

    # Batch-tiled path: stream x / out over a 1-D batch grid.  Weights and
    # biases use constant index_maps so they stay VMEM-resident across tiles.
    block_m = _pick_block_m(B)
    n_tiles = pl.cdiv(B, block_m)
    const = lambda shape: pl.BlockSpec(shape, lambda i: (0, 0))

    return pl.pallas_call(
        kernel,
        out_shape=jax.ShapeDtypeStruct((B, OUTPUT_SIZE), jnp.float32),
        grid=(n_tiles,),
        in_specs=[
            pl.BlockSpec((block_m, INPUT_SIZE), lambda i: (i, 0)),   # x tile
            const((INPUT_SIZE, HIDDEN_SIZE)),                        # w1
            const((1, HIDDEN_SIZE)),                                 # b1
            const((HIDDEN_SIZE, HIDDEN_SIZE)),                       # w2
            const((1, HIDDEN_SIZE)),                                 # b2
            const((HIDDEN_SIZE, OUTPUT_SIZE)),                       # w3
            const((1, OUTPUT_SIZE)),                                 # b3
        ],
        out_specs=pl.BlockSpec((block_m, OUTPUT_SIZE), lambda i: (i, 0)),
        compiler_params=pltpu.CompilerParams(
            dimension_semantics=("parallel",),  # batch tiles split across TCs (v7x)
        ),
    )(x, w1, b1, w2, b2, w3, b3)


def init_params(key):
    """Deterministic synthetic parameters matching nn.Linear shapes
    (stored transposed as (in, out))."""
    k1, k2, k3, k4, k5, k6 = jax.random.split(key, 6)
    scale1 = 1.0 / jnp.sqrt(INPUT_SIZE)
    scale2 = 1.0 / jnp.sqrt(HIDDEN_SIZE)
    return {
        "w1": jax.random.uniform(k1, (INPUT_SIZE, HIDDEN_SIZE), jnp.float32,
                                 -scale1, scale1),
        "b1": jax.random.uniform(k2, (1, HIDDEN_SIZE), jnp.float32,
                                 -scale1, scale1),
        "w2": jax.random.uniform(k3, (HIDDEN_SIZE, HIDDEN_SIZE), jnp.float32,
                                 -scale2, scale2),
        "b2": jax.random.uniform(k4, (1, HIDDEN_SIZE), jnp.float32,
                                 -scale2, scale2),
        "w3": jax.random.uniform(k5, (HIDDEN_SIZE, OUTPUT_SIZE), jnp.float32,
                                 -scale2, scale2),
        "b3": jax.random.uniform(k6, (1, OUTPUT_SIZE), jnp.float32,
                                 -scale2, scale2),
    }


def reference_forward(x, p):
    h1 = jnp.maximum(x @ p["w1"] + p["b1"], 0.0)
    h2 = jnp.maximum(h1 @ p["w2"] + p["b2"], 0.0)
    return h2 @ p["w3"] + p["b3"]


# TODO(synk): the _pretrain() Adam loop only produces initial weight values;
# it is replaced by deterministic init above (forward semantics are identical).

if __name__ == "__main__":
    key = jax.random.PRNGKey(0)
    pkey, xkey1, xkey2 = jax.random.split(key, 3)
    params = init_params(pkey)

    # Small batch: exercises the gridless, fully VMEM-resident path (no pad/slice).
    x_small = jax.random.normal(xkey1, (8, INPUT_SIZE), jnp.float32)
    out_small = jax.block_until_ready(enhanced_policy_forward(x_small, params))
    ref_small = reference_forward(x_small, params)
    assert out_small.shape == (8, OUTPUT_SIZE), out_small.shape
    assert jnp.allclose(out_small, ref_small, atol=1e-4, rtol=1e-4), \
        "small-batch mismatch vs JAX reference"

    # Larger batch: exercises the batch-tiled grid path, incl. a ragged last
    # tile handled by Pallas boundary masking (block_m=1280, grid=2).
    x_big = jax.random.normal(xkey2, (2500, INPUT_SIZE), jnp.float32)
    out_big = jax.block_until_ready(enhanced_policy_forward(x_big, params))
    ref_big = reference_forward(x_big, params)
    assert out_big.shape == (2500, OUTPUT_SIZE), out_big.shape
    assert jnp.allclose(out_big, ref_big, atol=1e-4, rtol=1e-4), \
        "tiled-batch mismatch vs JAX reference"

    # Opt-in bf16 MXU path (f32 accumulate): looser tolerance vs f32 reference.
    out_bf16 = jax.block_until_ready(
        enhanced_policy_forward(x_small, params, use_bf16=True))
    assert out_bf16.shape == (8, OUTPUT_SIZE), out_bf16.shape
    assert bool(jnp.all(jnp.isfinite(out_bf16)))
    assert jnp.allclose(out_bf16, ref_small, atol=1e-1, rtol=1e-1), \
        "bf16 path mismatch vs JAX reference (loose tolerance)"

    print("KERNEL_OK")
</pallas_src>

<mosaic_0001>
module attributes {stable_mosaic.version = 11 : i64} {
  func.func @_mlp_kernel(%arg0: memref<8x5xf32, #tpu.memory_space<vmem>>, %arg1: memref<5x128xf32, #tpu.memory_space<vmem>>, %arg2: memref<1x128xf32, #tpu.memory_space<vmem>>, %arg3: memref<128x128xf32, #tpu.memory_space<vmem>>, %arg4: memref<1x128xf32, #tpu.memory_space<vmem>>, %arg5: memref<128x5xf32, #tpu.memory_space<vmem>>, %arg6: memref<1x5xf32, #tpu.memory_space<vmem>>, %arg7: memref<8x5xf32, #tpu.memory_space<vmem>>) attributes {dimension_semantics = [], scalar_prefetch = 0 : i64, scratch_operands = 0 : i64, tpu.core_type = #tpu.core_type<tc>} {
    %c0 = arith.constant 0 : index
    %c0_0 = arith.constant 0 : index
    %0 = vector.load %arg0[%c0, %c0_0] : memref<8x5xf32, #tpu.memory_space<vmem>>, vector<8x5xf32>
    %c0_1 = arith.constant 0 : index
    %c0_2 = arith.constant 0 : index
    %1 = vector.load %arg1[%c0_1, %c0_2] : memref<5x128xf32, #tpu.memory_space<vmem>>, vector<5x128xf32>
    %cst = arith.constant dense<0.000000e+00> : vector<8x128xf32>
    %2 = tpu.matmul %0, %1, %cst {dimension_numbers = #tpu.dot_dimension_numbers<[1], [0], [0], [1], [0, 0, 1, 1], [], []>} : vector<8x5xf32>, vector<5x128xf32>, vector<8x128xf32> -> vector<8x128xf32>
    %c0_3 = arith.constant 0 : index
    %c0_4 = arith.constant 0 : index
    %3 = vector.load %arg2[%c0_3, %c0_4] : memref<1x128xf32, #tpu.memory_space<vmem>>, vector<1x128xf32>
    %4 = vector.broadcast %3 : vector<1x128xf32> to vector<8x128xf32>
    %5 = arith.addf %2, %4 : vector<8x128xf32>
    %cst_5 = arith.constant 0.000000e+00 : f32
    %6 = vector.broadcast %cst_5 : f32 to vector<8x128xf32>
    %7 = arith.maximumf %5, %6 : vector<8x128xf32>
    %c0_6 = arith.constant 0 : index
    %c0_7 = arith.constant 0 : index
    %8 = vector.load %arg3[%c0_6, %c0_7] : memref<128x128xf32, #tpu.memory_space<vmem>>, vector<128x128xf32>
    %cst_8 = arith.constant dense<0.000000e+00> : vector<8x128xf32>
    %9 = tpu.matmul %7, %8, %cst_8 {dimension_numbers = #tpu.dot_dimension_numbers<[1], [0], [0], [1], [0, 0, 1, 1], [], []>} : vector<8x128xf32>, vector<128x128xf32>, vector<8x128xf32> -> vector<8x128xf32>
    %c0_9 = arith.constant 0 : index
    %c0_10 = arith.constant 0 : index
    %10 = vector.load %arg4[%c0_9, %c0_10] : memref<1x128xf32, #tpu.memory_space<vmem>>, vector<1x128xf32>
    %11 = vector.broadcast %10 : vector<1x128xf32> to vector<8x128xf32>
    %12 = arith.addf %9, %11 : vector<8x128xf32>
    %cst_11 = arith.constant 0.000000e+00 : f32
    %13 = vector.broadcast %cst_11 : f32 to vector<8x128xf32>
    %14 = arith.maximumf %12, %13 : vector<8x128xf32>
    %c0_12 = arith.constant 0 : index
    %c0_13 = arith.constant 0 : index
    %15 = vector.load %arg5[%c0_12, %c0_13] : memref<128x5xf32, #tpu.memory_space<vmem>>, vector<128x5xf32>
    %cst_14 = arith.constant dense<0.000000e+00> : vector<8x5xf32>
    %16 = tpu.matmul %14, %15, %cst_14 {dimension_numbers = #tpu.dot_dimension_numbers<[1], [0], [0], [1], [0, 0, 1, 1], [], []>} : vector<8x128xf32>, vector<128x5xf32>, vector<8x5xf32> -> vector<8x5xf32>
    %c0_15 = arith.constant 0 : index
    %c0_16 = arith.constant 0 : index
    %17 = vector.load %arg6[%c0_15, %c0_16] : memref<1x5xf32, #tpu.memory_space<vmem>>, vector<1x5xf32>
    %18 = vector.broadcast %17 : vector<1x5xf32> to vector<8x5xf32>
    %19 = arith.addf %16, %18 : vector<8x5xf32>
    %c0_17 = arith.constant 0 : index
    %c0_18 = arith.constant 0 : index
    %20 = vector.load %arg7[%c0_17, %c0_18] : memref<8x5xf32, #tpu.memory_space<vmem>>, vector<8x5xf32>
    tpu.vector_store %arg7[%c0_17, %c0_18], %19 {strides = array<i32>} : memref<8x5xf32, #tpu.memory_space<vmem>>, vector<8x5xf32>,
    return
  }
}

</mosaic_0001>

<bundles_post_ra>
// kernel: enhanced_policy_forward.1
= control target key start
LH: loop header
LB: loop body
LE: loop exit
PB: predicated region body
PF: predicated region fallthrough
CT: control target
= control target key end

     0   :  { %vm40_vm0 = vcmask 1044480   ;;  %v509_v2 = vmov 0.0   ;;  %vm510_vm1 = vmmov 0   ;;  %vm36_vm2 = vcmask 39936   ;;  %s697_s0 = inlined_call_operand.vmem [shape: f32[8,5], index: 0, kind: input, shape index: {}]   ;;  %s698_s1 = inlined_call_operand.vmem [shape: f32[5,128], index: 1, kind: input, shape index: {}]   ;;  %s699_s2 = inlined_call_operand.vmem [shape: f32[1,128], index: 2, kind: input, shape index: {}]   ;;  %s700_s3 = inlined_call_operand.vmem [shape: f32[128,128], index: 3, kind: input, shape index: {}]   ;;  %s701_s4 = inlined_call_operand.vmem [shape: f32[1,128], index: 4, kind: input, shape index: {}]   ;;  %s702_s5 = inlined_call_operand.vmem [shape: f32[128,5], index: 5, kind: input, shape index: {}]   ;;  %s703_s6 = inlined_call_operand.vmem [shape: f32[1,5], index: 6, kind: input, shape index: {}]   ;;  %s704_s7 = inlined_call_operand.hbm [shape: f32[8,5], index: 7, kind: output, shape index: {}]  }
   0x1   :  { %v28_v0 = vld [vmem:[%s698_s1] sm:$0x1f]  ;;  %358 = vmatprep.subr.mxu0 %v509_v2  ;;  %360 = vmatprep.mubr.msk.f32.mxu0 %vm510_vm1, %v509_v2  ;;  %v116_v4 = vld [vmem:[%s700_s3 + $0x8] sm:$0xff]  ;;  %v117_v5 = vld [vmem:[%s700_s3 + $0x10] sm:$0xff]  ;;  %v511_v6 = vmov 0.0|0.0  }
   0x2   :  { %v27_v1 = vld [vmem:[%s697_s0] sm:$0xff]  ;;  %359 = vmatpush3.msk.msra.mxu0 %vm40_vm0, %v28_v0  ;;  %433 = vmatprep.subr.bf16.mxu1 %v511_v6  ;;  %v118_v8 = vld [vmem:[%s700_s3 + $0x18] sm:$0xff]  ;;  %v120_v11 = vld [vmem:[%s700_s3 + $0x28] sm:$0xff] }
   0x3   :  { %v115_v3 = vld [vmem:[%s700_s3] sm:$0xff]  ;;  %361 = vmatmul.mubr.msk.f32.vlgmr.msra.gmra.mrb[0].mxu0 %vm36_vm2, %v27_v1  ;;  %395 = vmatprep.mubr.msk.f32.mxu1 %vm510_vm1, %v509_v2  ;;  %v437_v9 = vpack.c.bf16 %v118_v8, %v117_v5 }
   0x4   :  { %v434_v7 = vpack.c.bf16 %v116_v4, %v115_v3  ;;  %457 = vmatprep.subr.bf16.mxu0 %v511_v6  ;;  %v119_v10 = vld [vmem:[%s700_s3 + $0x20] sm:$0xff]  ;;  %430 = vmatprep.mubr.msk.f32.mxu0 %vm510_vm1, %v509_v2 }
   0x6   :  { %435 = vmatpush3.bf16.msra.mxu1 %v434_v7 }
   0x7   :  { %436 = vmatprep.subr.bf16.mxu1 %v511_v6 }
   0x8   :  { %12 = vsyncpa [#allocation3], 0  ;;  %v440_v12 = vpack.c.bf16 %v120_v11, %v119_v10  ;;  %v121_v13 = vld [vmem:[%s700_s3 + $0x30] sm:$0xff]  ;;  %v122_v14 = vld [vmem:[%s700_s3 + $0x38] sm:$0xff]  ;;  %s512_s20 = smov [#allocation2]  }
   0x9   :  { %v443_v15 = vpack.c.bf16 %v122_v14, %v121_v13  ;;  %v123_v16 = vld [vmem:[%s700_s3 + $0x40] sm:$0xff]  ;;  %v124_v17 = vld [vmem:[%s700_s3 + $0x48] sm:$0xff]  ;;  %v125_v19 = vld [vmem:[%s700_s3 + $0x50] sm:$0xff]  ;;  %s309_s21 = sshll.u32 %s512_s20, 4  ;;  %s310_s21 = int_to_ptr.vmem [resolvable:$true] %s309_s21 }
   0xa   :  { %438 = vmatpush3.bf16.msra.mxu1 %v437_v9  ;;  %v446_v18 = vpack.c.bf16 %v124_v17, %v123_v16  ;;  %v126_v20 = vld [vmem:[%s700_s3 + $0x58] sm:$0xff]  ;;  %v127_v22 = vld [vmem:[%s700_s3 + $0x60] sm:$0xff]  ;;  %v128_v23 = vld [vmem:[%s700_s3 + $0x68] sm:$0xff]  ;;  %p490_p1 = scmp.lt.s32.totalorder %s310_s21, %s310_s21 }
   0xb   :  { %439 = vmatprep.subr.bf16.mxu1 %v511_v6  ;;  %v449_v21 = vpack.c.bf16 %v126_v20, %v125_v19  ;;  %v452_v24 = vpack.c.bf16 %v128_v23, %v127_v22  ;;  %v129_v25 = vld [vmem:[%s700_s3 + $0x70] sm:$0xff]  ;;  %v130_v26 = vld [vmem:[%s700_s3 + $0x78] sm:$0xff]  ;;  %v209_v28 = vld [vmem:[%s702_s5] sm:$0xff] }
   0xc   :  { %v455_v27 = vpack.c.bf16 %v130_v26, %v129_v25  ;;  %v210_v29 = vld [vmem:[%s702_s5 + $0x8] sm:$0xff]  ;;  %v211_v30 = vld [vmem:[%s702_s5 + $0x10] sm:$0xff]  ;;  %v212_v32 = vld [vmem:[%s702_s5 + $0x18] sm:$0xff] }
   0xd   :  { %v458_v31 = vpack.c.bf16 %v210_v29, %v209_v28  ;;  %v461_v33 = vpack.c.bf16 %v212_v32, %v211_v30  ;;  %v213_v34 = vld [vmem:[%s702_s5 + $0x20] sm:$0xff]  ;;  %v214_v35 = vld [vmem:[%s702_s5 + $0x28] sm:$0xff]  ;;  %v215_v37 = vld [vmem:[%s702_s5 + $0x30] sm:$0xff] }
   0xe   :  { %441 = vmatpush3.bf16.msra.mxu1 %v440_v12  ;;  %v464_v36 = vpack.c.bf16 %v214_v35, %v213_v34  ;;  %v216_v38 = vld [vmem:[%s702_s5 + $0x38] sm:$0xff]  ;;  %v217_v40 = vld [vmem:[%s702_s5 + $0x40] sm:$0xff]  ;;  %v218_v41 = vld [vmem:[%s702_s5 + $0x48] sm:$0xff] }
   0xf   :  { %442 = vmatprep.subr.bf16.mxu1 %v511_v6  ;;  %459 = vmatpush3.bf16.msra.mxu0 %v458_v31  ;;  %v467_v39 = vpack.c.bf16 %v216_v38, %v215_v37  ;;  %v470_v42 = vpack.c.bf16 %v218_v41, %v217_v40  ;;  %v219_v43 = vld [vmem:[%s702_s5 + $0x50] sm:$0xff]  ;;  %v220_v44 = vld [vmem:[%s702_s5 + $0x58] sm:$0xff]  ;;  %v221_v46 = vld [vmem:[%s702_s5 + $0x60] sm:$0xff] }
  0x10   :  { %460 = vmatprep.subr.bf16.mxu0 %v511_v6  ;;  %v473_v45 = vpack.c.bf16 %v220_v44, %v219_v43  ;;  %v222_v47 = vld [vmem:[%s702_s5 + $0x68] sm:$0xff]  ;;  %v317_v49 = vld [vmem:[%s699_s2] ss:$0 sm:$0xff]  ;;  %v223_v54 = vld [vmem:[%s702_s5 + $0x70] sm:$0xff] }
  0x11   :  { %v476_v48 = vpack.c.bf16 %v222_v47, %v221_v46  ;;  %v224_v55 = vld [vmem:[%s702_s5 + $0x78] sm:$0xff]  ;;  %v320_v57 = vld [vmem:[%s701_s4] ss:$0 sm:$0xff]  ;;  %s485_s5 = scalar_lea.vmem %s310_s21, 128 }
  0x12   :  { %444 = vmatpush3.bf16.msra.mxu1 %v443_v15  ;;  %v479_v56 = vpack.c.bf16 %v224_v55, %v223_v54  ;;  %v321_v62 = vld [vmem:[%s703_s6] ss:$0 sm:$0xff]  ;;  %p486_p0 = scmp.ne.s32.totalorder %s310_s21, %s485_s5  ;;  %p491_p2 = scmp.lt.s32.totalorder %s485_s5, %s485_s5 }
  0x13   :  { %445 = vmatprep.subr.bf16.mxu1 %v511_v6  ;;  %462 = vmatpush3.bf16.msra.mxu0 %v461_v33 }
  0x14   :  { %463 = vmatprep.subr.bf16.mxu0 %v511_v6  ;;  %p492_p3 = por %p491_p2, %p490_p1 }
  0x16   :  { %447 = vmatpush3.bf16.msra.mxu1 %v446_v18  ;;  %p493_p4 = pnand %p492_p3, %p486_p0 }
  0x17   :  { %448 = vmatprep.subr.bf16.mxu1 %v511_v6  ;;  %465 = vmatpush3.bf16.msra.mxu0 %v464_v36 }
  0x18   :  { %466 = vmatprep.subr.bf16.mxu0 %v511_v6 }
  0x1a   :  { %450 = vmatpush3.bf16.msra.mxu1 %v449_v21 }
  0x1b   :  { %451 = vmatprep.subr.bf16.mxu1 %v511_v6  ;;  %468 = vmatpush3.bf16.msra.mxu0 %v467_v39 }
  0x1c   :  { %469 = vmatprep.subr.bf16.mxu0 %v511_v6 }
  0x1e   :  { %453 = vmatpush3.bf16.msra.mxu1 %v452_v24 }
  0x1f   :  { %454 = vmatprep.subr.bf16.mxu1 %v511_v6  ;;  %471 = vmatpush3.bf16.msra.mxu0 %v470_v42 }
  0x20   :  { %472 = vmatprep.subr.bf16.mxu0 %v511_v6 }
  0x22   :  { %456 = vmatpush3.bf16.msra.mxu1 %v455_v27 }
  0x23   :  { %474 = vmatpush3.bf16.msra.mxu0 %v473_v45 }
  0x24   :  { %475 = vmatprep.subr.bf16.mxu0 %v511_v6 }
  0x27   :  { %477 = vmatpush3.bf16.msra.mxu0 %v476_v48 }
  0x28   :  { %478 = vmatprep.subr.bf16.mxu0 %v511_v6 }
  0x2b   :  { %480 = vmatpush3.bf16.msra.mxu0 %v479_v56 }
  0xd6   :  { %v110_v50 = vpop.f32.mrb[0].mxu0 }
  0xd7   :  { %v111_v51 = vadd.f32 %v317_v49, %v110_v50  ;;  %v362_v52 = vpop.f32.mrb[1].mxu0 }
  0xd9   :  { %v114_v53 = vmax.f32 %v111_v51, 0.0 }
  0xdb   :  { %396 = vmatmul.mubr.f32.vlgmr.msra.gmra.mrb[0].mxu1 %v114_v53 }
 0x1ae   :  { %v204_v58 = vpop.f32.mrb[0].mxu1 }
 0x1af   :  { %v205_v59 = vadd.f32 %v320_v57, %v204_v58  ;;  %v397_v60 = vpop.f32.mrb[1].mxu1 }
 0x1b1   :  { %v208_v61 = vmax.f32 %v205_v59, 0.0 }
 0x1b3   :  { %431 = vmatmul.mubr.f32.vlgmr.msra.gmra.mrb[2].mxu0 %v208_v61 }
 0x286   :  { %v298_v63 = vpop.f32.mrb[2].mxu0 }
 0x287   :  { %v299_v0 = vadd.f32 %v321_v62, %v298_v63  ;;  %v432_v1 = vpop.f32.mrb[3].mxu0 }
 0x289   :  { %302 = vst.msk [vmem:[#allocation2] sm:$0xff] %vm36_vm2, %v299_v0 }
 0x28a   :  { %496 = shalt.err (!%p493_p4)
}
 0x28b   :  { %s497_s23 = scalar_lea.hbm %s704_s7, 128 }
 0x28c   :  { %p498_p5 = scmp.ne.s32.totalorder %s704_s7, %s497_s23  ;;  %p501_p6 = scmp.lt.u32.totalorder %s497_s23, %s704_s7 }
 0x28e   :  { %p503_p7 = pnand %p501_p6, %p498_p5 }
 0x290   :  { %506 = shalt.err (!%p503_p7)
}
 0x291   :  { %312 = dma.vmem_to_hbm [thread:$0]  %s310_s21, 128, %s704_s7, [#allocation3]  }
 0x292   :  { %507 = dma.done.wait [#allocation3], 128  }
 0x293   :  { %508 = vsyncadd [#allocation3], 4294967168 }
 0x294   :  { %316 = vsyncpa [#allocation3], 1 }

</bundles_post_ra>
